<compile_context>
chip_gen: v7x
topology: tpu7x:2x2x1
jax: 0.10.0
libtpu: 0.0.40
codegen_flags: <defaults>
</compile_context>

<pallas_src>
import functools

import jax
import jax.numpy as jnp
from jax.experimental import pallas as pl
from jax.experimental.pallas import tpu as pltpu


def _round_up(v, m):
    return (v + m - 1) // m * m


def _gating_kernel(x_ref, w_ref, b_ref, o_ref, *, k: int):
    # MXU consumes the native input dtype; accumulate logits in f32.
    logits = jnp.dot(x_ref[...], w_ref[...],
                     preferred_element_type=jnp.float32)
    logits = logits + b_ref[...].astype(jnp.float32)            # [Bt, Ep] f32
    bt, e = logits.shape

    col = jax.lax.broadcasted_iota(jnp.int32, (bt, e), 1)        # [Bt, Ep]

    remaining = logits
    mx = None                                                    # row max (pick 0)
    denom = jnp.zeros((bt, 1), jnp.float32)
    out_u = jnp.zeros((bt, e), jnp.float32)                      # unnormalized gates
    for j in range(k):                                           # k is small & static
        m = jnp.max(remaining, axis=-1, keepdims=True)           # [Bt, 1]
        if j == 0:
            mx = m
        is_max = remaining == m
        # First-occurrence tie-break (lowest expert index among equal logits),
        # matching torch.topk / lax.top_k ordering.
        idx = jnp.min(jnp.where(is_max, col, e), axis=-1, keepdims=True)
        sel = col == idx                                         # [Bt, Ep] one-hot
        ex = jnp.exp(m - mx)                                     # [Bt, 1]
        denom = denom + ex
        out_u = out_u + jnp.where(sel, ex, 0.0)                  # fused scatter
        remaining = jnp.where(sel, -jnp.inf, remaining)

    inv = 1.0 / denom                                            # exact, [Bt, 1]
    o_ref[...] = (out_u * inv).astype(o_ref.dtype)


def gating_func(x, w_t, b, *, k=2, batch_tile=None):
    """x: [B, D], w_t: [D, E] (W transposed), b: [1, E] -> [B, E] sparse gates."""
    bsz, d = x.shape
    e = w_t.shape[1]
    assert b.shape == (1, e)
    assert 1 <= k <= e, "top-k must satisfy 1 <= k <= num_experts"

    e_pad = _round_up(e, 128)            # lane-dense output + full MXU N-dim
    out_dtype = x.dtype
    x_bytes = jnp.dtype(x.dtype).itemsize
    w_bytes = jnp.dtype(w_t.dtype).itemsize
    b_bytes = jnp.dtype(b.dtype).itemsize
    out_bytes = jnp.dtype(out_dtype).itemsize

    if batch_tile is None:
        # Keep the streamed (double-buffered) per-row traffic under ~16 MiB so
        # W (+ headroom) still fits v7x's 64 MiB VMEM per TensorCore.
        budget = 16 * 1024 * 1024
        per_row = 2 * d * x_bytes + 2 * e_pad * out_bytes
        batch_tile = max(8, min(1024, budget // max(per_row, 1)))
    batch_tile = max(8, (min(batch_tile, _round_up(bsz, 8)) // 8) * 8)
    batch_pad = _round_up(bsz, batch_tile)

    x_p = jnp.pad(x, ((0, batch_pad - bsz), (0, 0))) if batch_pad != bsz else x
    if e_pad != e:
        w_p = jnp.pad(w_t, ((0, 0), (0, e_pad - e)))
        # Padded experts get a very negative bias -> never selected by top-k.
        b_p = jnp.pad(b, ((0, 0), (0, e_pad - e)), constant_values=-1e30)
    else:
        w_p, b_p = w_t, b

    # Scoped-VMEM request sized to the chosen tiles (with headroom), capped to
    # leave slack against v7x's 64 MiB physical VMEM.
    needed = (2 * batch_tile * d * x_bytes
              + 2 * batch_tile * e_pad * out_bytes
              + 2 * d * e_pad * w_bytes
              + 2 * e_pad * b_bytes
              + (2 << 20))
    vmem_limit = int(min(max(2 * needed, 32 * 1024 * 1024), 56 * 1024 * 1024))

    cost = pl.CostEstimate(
        flops=2 * batch_pad * d * e_pad,
        transcendentals=batch_pad * k,
        bytes_accessed=(batch_pad * d * x_bytes + d * e_pad * w_bytes
                        + e_pad * b_bytes + batch_pad * e_pad * out_bytes),
    )

    call = pl.pallas_call(
        functools.partial(_gating_kernel, k=k),
        out_shape=jax.ShapeDtypeStruct((batch_pad, e_pad), out_dtype),
        grid_spec=pltpu.PrefetchScalarGridSpec(
            num_scalar_prefetch=0,
            grid=(batch_pad // batch_tile,),
            in_specs=[
                pl.BlockSpec((batch_tile, d), lambda i: (i, 0)),
                # Grid-invariant operands: same block index every step, so the
                # pipeline only DMAs them once.
                pl.BlockSpec((d, e_pad), lambda i: (0, 0)),
                pl.BlockSpec((1, e_pad), lambda i: (0, 0)),
            ],
            out_specs=pl.BlockSpec((batch_tile, e_pad), lambda i: (i, 0)),
        ),
        compiler_params=pltpu.CompilerParams(
            dimension_semantics=("parallel",),
            vmem_limit_bytes=vmem_limit),
        cost_estimate=cost,
    )
    out = call(x_p, w_p, b_p)
    return out[:bsz, :e]


def _reference(x, w_t, b, k=2):
    logits = x @ w_t + b
    vals, idx = jax.lax.top_k(logits, k)
    gate = jax.nn.softmax(vals, axis=-1)
    out = jnp.zeros_like(logits).at[
        jnp.arange(logits.shape[0])[:, None], idx].set(gate)
    return out


if __name__ == "__main__":
    key = jax.random.PRNGKey(0)
    k_x, k_w, k_b = jax.random.split(key, 3)

    batch, input_dim, num_experts, top_k = 8, 32, 8, 2

    x = jax.random.normal(k_x, (batch, input_dim), dtype=jnp.float32)
    # Deterministic Linear init (uniform, PyTorch-style bound 1/sqrt(fan_in)).
    bound = 1.0 / (input_dim ** 0.5)
    w = jax.random.uniform(k_w, (num_experts, input_dim),
                           minval=-bound, maxval=bound, dtype=jnp.float32)
    b = jax.random.uniform(k_b, (num_experts,),
                           minval=-bound, maxval=bound, dtype=jnp.float32)

    w_t = w.T                          # [D, E]
    b2 = b.reshape(1, num_experts)     # [1, E]

    # f32 path: exact comparison against the pure-JAX reference.
    out = jax.block_until_ready(gating_func(x, w_t, b2, k=top_k))
    ref = _reference(x, w_t, b2, k=top_k)
    assert out.shape == (batch, num_experts)
    assert jnp.allclose(out, ref, atol=1e-5, rtol=1e-5)
    assert jnp.allclose(out.sum(axis=-1), jnp.ones((batch,)), atol=1e-5)

    # bf16 path: native-dtype feed straight into the MXU (structural checks
    # only, since near-ties can legitimately reorder under bf16 logits).
    xb = x.astype(jnp.bfloat16)
    wb = w_t.astype(jnp.bfloat16)
    bb = b2.astype(jnp.bfloat16)
    out_bf16 = jax.block_until_ready(gating_func(xb, wb, bb, k=top_k))
    out_bf16 = out_bf16.astype(jnp.float32)
    assert out_bf16.shape == (batch, num_experts)
    assert jnp.all((out_bf16 > 0).sum(axis=-1) == top_k)
    assert jnp.allclose(out_bf16.sum(axis=-1), jnp.ones((batch,)), atol=2e-2)

    print("KERNEL_OK")
</pallas_src>

<mosaic_0001>
module attributes {stable_mosaic.version = 11 : i64} {
  func.func @_gating_kernel(%arg0: i32, %arg1: memref<8x32xf32, #tpu.memory_space<vmem>>, %arg2: memref<32x128xf32, #tpu.memory_space<vmem>>, %arg3: memref<1x128xf32, #tpu.memory_space<vmem>>, %arg4: memref<8x128xf32, #tpu.memory_space<vmem>>) attributes {dimension_semantics = [#tpu.dimension_semantics<parallel>], iteration_bounds = array<i64: 1>, scalar_prefetch = 0 : i64, scratch_operands = 0 : i64, tpu.core_type = #tpu.core_type<tc>, window_params = [{transform_indices = @transform_0, window_bounds = array<i64: 8, 32>}, {pipeline_mode = #tpu.pipeline_mode<synchronous>, transform_indices = @transform_1, window_bounds = array<i64: 32, 128>}, {pipeline_mode = #tpu.pipeline_mode<synchronous>, transform_indices = @transform_2, window_bounds = array<i64: 1, 128>}, {transform_indices = @transform_3, window_bounds = array<i64: 8, 128>}]} {
    %c0 = arith.constant 0 : index
    %c0_0 = arith.constant 0 : index
    %0 = vector.load %arg1[%c0, %c0_0] : memref<8x32xf32, #tpu.memory_space<vmem>>, vector<8x32xf32>
    %c0_1 = arith.constant 0 : index
    %c0_2 = arith.constant 0 : index
    %1 = vector.load %arg2[%c0_1, %c0_2] : memref<32x128xf32, #tpu.memory_space<vmem>>, vector<32x128xf32>
    %cst = arith.constant dense<0.000000e+00> : vector<8x128xf32>
    %2 = tpu.matmul %0, %1, %cst {dimension_numbers = #tpu.dot_dimension_numbers<[1], [0], [0], [1], [0, 0, 1, 1], [], []>} : vector<8x32xf32>, vector<32x128xf32>, vector<8x128xf32> -> vector<8x128xf32>
    %c0_3 = arith.constant 0 : index
    %c0_4 = arith.constant 0 : index
    %3 = vector.load %arg3[%c0_3, %c0_4] : memref<1x128xf32, #tpu.memory_space<vmem>>, vector<1x128xf32>
    %4 = vector.broadcast %3 : vector<1x128xf32> to vector<8x128xf32>
    %5 = arith.addf %2, %4 : vector<8x128xf32>
    %6 = tpu.iota {dimensions = array<i32: 1>} : vector<8x128xi32>
    %cst_5 = arith.constant 0.000000e+00 : f32
    %7 = vector.broadcast %cst_5 : f32 to vector<8x1xf32>
    %cst_6 = arith.constant 0.000000e+00 : f32
    %8 = vector.broadcast %cst_6 : f32 to vector<8x128xf32>
    %cst_7 = arith.constant dense<0xFF800000> : vector<8xf32>
    %9 = vector.multi_reduction <maximumf>, %5, %cst_7 [1] : vector<8x128xf32> to vector<8xf32>
    %10 = vector.shape_cast %9 : vector<8xf32> to vector<8x1xf32>
    %11 = vector.broadcast %10 : vector<8x1xf32> to vector<8x128xf32>
    %12 = arith.cmpf oeq, %5, %11 : vector<8x128xf32>
    %c128_i32 = arith.constant 128 : i32
    %13 = vector.broadcast %c128_i32 : i32 to vector<8x128xi32>
    %14 = arith.select %12, %6, %13 : vector<8x128xi1>, vector<8x128xi32>
    %cst_8 = arith.constant dense<2147483647> : vector<8xi32>
    %15 = vector.multi_reduction <minsi>, %14, %cst_8 [1] : vector<8x128xi32> to vector<8xi32>
    %16 = vector.shape_cast %15 : vector<8xi32> to vector<8x1xi32>
    %17 = vector.broadcast %16 : vector<8x1xi32> to vector<8x128xi32>
    %18 = arith.cmpi eq, %6, %17 : vector<8x128xi32>
    %19 = arith.subf %10, %10 : vector<8x1xf32>
    %20 = math.exp %19 : vector<8x1xf32>
    %21 = arith.addf %7, %20 : vector<8x1xf32>
    %cst_9 = arith.constant 0.000000e+00 : f32
    %22 = vector.shape_cast %20 : vector<8x1xf32> to vector<8x1xf32>
    %23 = vector.broadcast %22 : vector<8x1xf32> to vector<8x128xf32>
    %24 = vector.broadcast %cst_9 : f32 to vector<8x128xf32>
    %25 = arith.select %18, %23, %24 : vector<8x128xi1>, vector<8x128xf32>
    %26 = arith.addf %8, %25 : vector<8x128xf32>
    %cst_10 = arith.constant 0xFF800000 : f32
    %27 = vector.broadcast %cst_10 : f32 to vector<8x128xf32>
    %28 = arith.select %18, %27, %5 : vector<8x128xi1>, vector<8x128xf32>
    %cst_11 = arith.constant dense<0xFF800000> : vector<8xf32>
    %29 = vector.multi_reduction <maximumf>, %28, %cst_11 [1] : vector<8x128xf32> to vector<8xf32>
    %30 = vector.shape_cast %29 : vector<8xf32> to vector<8x1xf32>
    %31 = vector.broadcast %30 : vector<8x1xf32> to vector<8x128xf32>
    %32 = arith.cmpf oeq, %28, %31 : vector<8x128xf32>
    %c128_i32_12 = arith.constant 128 : i32
    %33 = vector.broadcast %c128_i32_12 : i32 to vector<8x128xi32>
    %34 = arith.select %32, %6, %33 : vector<8x128xi1>, vector<8x128xi32>
    %cst_13 = arith.constant dense<2147483647> : vector<8xi32>
    %35 = vector.multi_reduction <minsi>, %34, %cst_13 [1] : vector<8x128xi32> to vector<8xi32>
    %36 = vector.shape_cast %35 : vector<8xi32> to vector<8x1xi32>
    %37 = vector.broadcast %36 : vector<8x1xi32> to vector<8x128xi32>
    %38 = arith.cmpi eq, %6, %37 : vector<8x128xi32>
    %39 = arith.subf %30, %10 : vector<8x1xf32>
    %40 = math.exp %39 : vector<8x1xf32>
    %41 = arith.addf %21, %40 : vector<8x1xf32>
    %cst_14 = arith.constant 0.000000e+00 : f32
    %42 = vector.shape_cast %40 : vector<8x1xf32> to vector<8x1xf32>
    %43 = vector.broadcast %42 : vector<8x1xf32> to vector<8x128xf32>
    %44 = vector.broadcast %cst_14 : f32 to vector<8x128xf32>
    %45 = arith.select %38, %43, %44 : vector<8x128xi1>, vector<8x128xf32>
    %46 = arith.addf %26, %45 : vector<8x128xf32>
    %cst_15 = arith.constant 1.000000e+00 : f32
    %47 = vector.broadcast %cst_15 : f32 to vector<8x1xf32>
    %48 = arith.divf %47, %41 : vector<8x1xf32>
    %49 = vector.broadcast %48 : vector<8x1xf32> to vector<8x128xf32>
    %50 = arith.mulf %46, %49 : vector<8x128xf32>
    %c0_16 = arith.constant 0 : index
    %c0_17 = arith.constant 0 : index
    %51 = vector.load %arg4[%c0_16, %c0_17] : memref<8x128xf32, #tpu.memory_space<vmem>>, vector<8x128xf32>
    tpu.vector_store %arg4[%c0_16, %c0_17], %50 {strides = array<i32>} : memref<8x128xf32, #tpu.memory_space<vmem>>, vector<8x128xf32>,
    return
  }
  func.func @transform_0(%arg0: i32) -> (i32, i32) {
    %c0_i32 = arith.constant 0 : i32
    %c0_i32_0 = arith.constant 0 : i32
    return %arg0, %c0_i32 : i32, i32
  }
  func.func @transform_1(%arg0: i32) -> (i32, i32) {
    %c0_i32 = arith.constant 0 : i32
    %c0_i32_0 = arith.constant 0 : i32
    %c0_i32_1 = arith.constant 0 : i32
    return %c0_i32, %c0_i32_0 : i32, i32
  }
  func.func @transform_2(%arg0: i32) -> (i32, i32) {
    %c0_i32 = arith.constant 0 : i32
    %c0_i32_0 = arith.constant 0 : i32
    %c0_i32_1 = arith.constant 0 : i32
    return %c0_i32, %c0_i32_0 : i32, i32
  }
  func.func @transform_3(%arg0: i32) -> (i32, i32) {
    %c0_i32 = arith.constant 0 : i32
    %c0_i32_0 = arith.constant 0 : i32
    return %arg0, %c0_i32 : i32, i32
  }
}

</mosaic_0001>

<bundles_post_ra>
// kernel: tpu_custom_call.1
= control target key start
LH: loop header
LB: loop body
LE: loop exit
PB: predicated region body
PF: predicated region fallthrough
CT: control target
= control target key end

     0   :  { %8 = vsyncpa [#allocation3], 0  ;;  %s386_s0 = inlined_call_operand.hbm [shape: f32[8,32], index: 0, kind: input, shape index: {}]   ;;  %s387_s1 = inlined_call_operand.hbm [shape: f32[32,128], index: 1, kind: input, shape index: {}]   ;;  %s388_s2 = inlined_call_operand.vmem [shape: f32[1,128], index: 2, kind: input, shape index: {}]   ;;  %s389_s3 = inlined_call_operand.hbm [shape: f32[8,128], index: 3, kind: output, shape index: {}]  }
   0x1   :  { %9 = vsyncpa [#allocation6], 0 }
   0x2   :  { %10 = vsyncpa [#allocation4], 0  ;;  %s310_s12 = smov [#allocation2]   ;;  %s311_s14 = smov [#allocation5]  }
   0x3   :  { %s17_s13 = sshll.u32 %s310_s12, 4  ;;  %s26_s15 = sshll.u32 %s311_s14, 4  ;;  %s18_s13 = int_to_ptr.vmem [resolvable:$true] %s17_s13  ;;  %s338_s15 = int_to_ptr.vmem [resolvable:$true] %s26_s15 }
   0x4   :  { %s238_s18 = scalar_lea.hbm %s386_s0, 128 }
   0x5   :  { %p239_p0 = scmp.ne.s32.totalorder %s386_s0, %s238_s18  ;;  %p242_p1 = scmp.lt.u32.totalorder %s238_s18, %s386_s0 }
   0x7   :  { %p244_p2 = pnand %p242_p1, %p239_p0 }
   0x9   :  { %247 = shalt.err (!%p244_p2)
}
   0xa   :  { %s248_s23 = scalar_lea.vmem %s18_s13, 128  ;;  %p253_p4 = scmp.lt.s32.totalorder %s18_s13, %s18_s13 }
   0xb   :  { %p249_p3 = scmp.ne.s32.totalorder %s18_s13, %s248_s23  ;;  %p254_p5 = scmp.lt.s32.totalorder %s248_s23, %s248_s23 }
   0xd   :  { %p255_p6 = por %p254_p5, %p253_p4 }
   0xf   :  { %p256_p7 = pnand %p255_p6, %p249_p3 }
  0x11   :  { %259 = shalt.err (!%p256_p7)
}
  0x12   :  { %20 = dma.hbm_to_vmem [thread:$0]  %s386_s0, 128, %s18_s13, [#allocation3]  }
  0x13   :  { %s260_s28 = scalar_lea.hbm %s387_s1, 512 }
  0x14   :  { %p261_p8 = scmp.ne.s32.totalorder %s387_s1, %s260_s28  ;;  %p264_p9 = scmp.lt.u32.totalorder %s260_s28, %s387_s1 }
  0x16   :  { %p266_p10 = pnand %p264_p9, %p261_p8 }
  0x18   :  { %269 = shalt.err (!%p266_p10)
}
  0x19   :  { %s270_s6 = scalar_lea.vmem %s338_s15, 512  ;;  %p275_p12 = scmp.lt.s32.totalorder %s338_s15, %s338_s15 }
  0x1a   :  { %p271_p11 = scmp.ne.s32.totalorder %s338_s15, %s270_s6  ;;  %p276_p13 = scmp.lt.s32.totalorder %s270_s6, %s270_s6 }
  0x1c   :  { %p277_p0 = por %p276_p13, %p275_p12 }
  0x1e   :  { %p278_p1 = pnand %p277_p0, %p271_p11 }
  0x20   :  { %281 = shalt.err (!%p278_p1)
}
  0x21   :  { %s312_s0 = smov 128   ;;  %s313_s7 = smov 8  }
  0x22   :  { %32 = dma.hbm_to_vmem [thread:$0]  %s387_s1, 512, %s338_s15, [#allocation6], %s312_s0, %s312_s0, %s313_s7  }
  0x23   :  { %304 = dma.done.wait [#allocation3], 128  }
  0x24   :  { %305 = vsyncadd [#allocation3], 4294967168 }
  0x25   :  { %306 = dma.done.wait [#allocation6], 512  }
  0x26   :  { %307 = vsyncadd [#allocation6], 4294966784  ;;  %v314_v0 = vmov 0.0|0.0   ;;  %vm315_vm0 = vmmov 0   ;;  %v316_v1 = vmov 0.0   ;;  %v42_v2 = vld [vmem:[#allocation5] sm:$0xff]  ;;  %v127_v13 = vlaneseq }
  0x27   :  { %218 = vmatprep.subr.bf16.mxu0 %v314_v0  ;;  %215 = vmatprep.mubr.msk.f32.mxu0 %vm315_vm0, %v316_v1  ;;  %v43_v3 = vld [vmem:[#allocation5 + $0x8] sm:$0xff]  ;;  %v44_v4 = vld [vmem:[#allocation5 + $0x10] sm:$0xff]  ;;  %v45_v6 = vld [vmem:[#allocation5 + $0x18] sm:$0xff]  ;;  %vm53_vm1 = vcmask 261120  }
  0x28   :  { %v219_v5 = vpack.c.bf16 %v43_v3, %v42_v2  ;;  %v222_v7 = vpack.c.bf16 %v45_v6, %v44_v4  ;;  %v41_v8 = vld [vmem:[#allocation2] sm:$0xff]  ;;  %v128_v14 = vand.u32 127, %v127_v13 }
  0x29   :  { %v200_v9 = vld [vmem:[%s388_s2] ss:$0 sm:$0xff]  ;;  %s317_s2 = smov [#allocation7]  }
  0x2a   :  { %220 = vmatpush3.bf16.msra.mxu0 %v219_v5  ;;  %s190_s11 = sshll.u32 %s317_s2, 4  ;;  %s191_s11 = int_to_ptr.vmem [resolvable:$true] %s190_s11 }
  0x2b   :  { %221 = vmatprep.subr.bf16.mxu0 %v314_v0  ;;  %s282_s12 = scalar_lea.vmem %s191_s11, 128  ;;  %p287_p3 = scmp.lt.s32.totalorder %s191_s11, %s191_s11 }
  0x2c   :  { %p283_p2 = scmp.ne.s32.totalorder %s191_s11, %s282_s12  ;;  %p288_p4 = scmp.lt.s32.totalorder %s282_s12, %s282_s12 }
  0x2e   :  { %223 = vmatpush3.bf16.msra.mxu0 %v222_v7  ;;  %p289_p5 = por %p288_p4, %p287_p3 }
  0x30   :  { %p290_p6 = pnand %p289_p5, %p283_p2 }
  0x31   :  { %216 = vmatmul.mubr.msk.f32.vlgmr.msra.gmra.mrb[0].mxu0 %vm53_vm1, %v41_v8 }
 0x104   :  { %v123_v10 = vpop.f32.mrb[0].mxu0 }
 0x105   :  { %v124_v11 = vadd.f32 %v200_v9, %v123_v10  ;;  %v217_v12 = vpop.f32.mrb[1].mxu0 }
 0x107   :  { %129 = vmax.xlane.f32.xlu0 %v124_v11 }
 0x194   :  { %v130_v15 = vpop.xlane.xlu0 %129 }
 0x195   :  { %vm131_vm2 = vcmp.eq.f32.partialorder %v124_v11, %v130_v15  ;;  %v148_v38 = vsub.f32 %v130_v15, %v130_v15 }
 0x196   :  { %v132_v16 = vsel %vm131_vm2, %v128_v14, 128 }
 0x197   :  { %v134_v17 = vshra.s32 %v132_v16, 16  ;;  %v133_v19 = vand.u32 65535, %v132_v16  ;;  %v149_v40 = vmul.f32 1.442695, %v148_v38 }
 0x199   :  { %v136_v18 = vcvt.s32.f32 %v134_v17  ;;  %v135_v21 = vcvt.s32.f32 %v133_v19 }
 0x19b   :  { %137 = vmin.xlane.f32.xlu0 %v136_v18 }
 0x228   :  { %v138_v20 = vpop.xlane.xlu0 %137 }
 0x229   :  { %vm139_vm3 = vcmp.eq.f32.partialorder %v136_v18, %v138_v20  ;;  %v144_v23 = vcvt.f32.s32 %v138_v20 }
 0x22a   :  { %v140_v22 = vsel %vm139_vm3, %v135_v21, inf }
 0x22b   :  { %141 = vmin.xlane.f32.xlu1 %v140_v22  ;;  %v145_v25 = vshll.u32 %v144_v23, 16 }
 0x2b8   :  { %v142_v24 = vpop.xlane.xlu1 %141 }
 0x2b9   :  { %v143_v26 = vcvt.f32.s32 %v142_v24 }
 0x2bb   :  { %v146_v27 = vadd.s32 %v145_v25, %v143_v26 }
 0x2bd   :  { %vm147_vm4 = vcmp.eq.s32.totalorder %v128_v14, %v146_v27 }
 0x2be   :  { %v154_v28 = vsel %vm147_vm4, -inf, %v124_v11 }
 0x2bf   :  { %155 = vmax.xlane.f32.xlu1 %v154_v28 }
 0x34c   :  { %v156_v29 = vpop.xlane.xlu1 %155 }
 0x34d   :  { %vm157_vm5 = vcmp.eq.f32.partialorder %v154_v28, %v156_v29  ;;  %v174_v37 = vsub.f32 %v156_v29, %v130_v15 }
 0x34e   :  { %v158_v30 = vsel %vm157_vm5, %v128_v14, 128 }
 0x34f   :  { %v160_v31 = vshra.s32 %v158_v30, 16  ;;  %v159_v33 = vand.u32 65535, %v158_v30  ;;  %v175_v39 = vmul.f32 1.442695, %v174_v37 }
 0x351   :  { %v162_v32 = vcvt.s32.f32 %v160_v31  ;;  %v161_v35 = vcvt.s32.f32 %v159_v33  ;;  %232 = vpow2.f32 %v175_v39 }
 0x352   :  { %234 = vpow2.f32 %v149_v40 }
 0x353   :  { %163 = vmin.xlane.f32.xlu0 %v162_v32 }
 0x35b   :  { %v233_v41 = vpop.eup %232 }
 0x35c   :  { %v235_v42 = vpop.eup %234 }
 0x35d   :  { %v177_v43 = vadd.f32 %v235_v42, %v233_v41  ;;  %v152_v49 = vsel %vm147_vm4, %v235_v42, 0.0 }
 0x35f   :  { %236 = vrcp.f32 %v177_v43 }
 0x369   :  { %v237_v52 = vpop.eup %236 }
 0x3e0   :  { %v164_v34 = vpop.xlane.xlu0 %163 }
 0x3e1   :  { %vm165_vm6 = vcmp.eq.f32.partialorder %v162_v32, %v164_v34  ;;  %v170_v44 = vcvt.f32.s32 %v164_v34 }
 0x3e2   :  { %v166_v36 = vsel %vm165_vm6, %v161_v35, inf }
 0x3e3   :  { %167 = vmin.xlane.f32.xlu1 %v166_v36  ;;  %v171_v46 = vshll.u32 %v170_v44, 16 }
 0x470   :  { %v168_v45 = vpop.xlane.xlu1 %167 }
 0x471   :  { %v169_v47 = vcvt.f32.s32 %v168_v45 }
 0x473   :  { %v172_v48 = vadd.s32 %v171_v46, %v169_v47 }
 0x475   :  { %vm173_vm7 = vcmp.eq.s32.totalorder %v128_v14, %v172_v48 }
 0x476   :  { %v178_v50 = vsel %vm173_vm7, %v233_v41, 0.0 }
 0x477   :  { %v179_v51 = vadd.f32 %v178_v50, %v152_v49 }
 0x479   :  { %v182_v53 = vmul.f32 %v237_v52, %v179_v51 }
 0x47b   :  { %183 = vst [vmem:[#allocation7] sm:$0xff] %v182_v53 }
 0x47c   :  { %293 = shalt.err (!%p290_p6)
}
 0x47d   :  { %s294_s15 = scalar_lea.hbm %s389_s3, 128 }
 0x47e   :  { %p295_p7 = scmp.ne.s32.totalorder %s389_s3, %s294_s15  ;;  %p298_p8 = scmp.lt.u32.totalorder %s294_s15, %s389_s3 }
 0x480   :  { %p300_p9 = pnand %p298_p8, %p295_p7 }
 0x482   :  { %303 = shalt.err (!%p300_p9)
}
 0x483   :  { %193 = dma.vmem_to_hbm [thread:$0]  %s191_s11, 128, %s389_s3, [#allocation4]  }
 0x484   :  { %308 = dma.done.wait [#allocation4], 128  }
 0x485   :  { %309 = vsyncadd [#allocation4], 4294967168 }
 0x486   :  { %197 = vsyncpa [#allocation3], 1 }
 0x487   :  { %198 = vsyncpa [#allocation6], 1 }
 0x488   :  { %199 = vsyncpa [#allocation4], 1 }

</bundles_post_ra>
